<compile_context>
chip_gen: v7x
topology: tpu7x:2x2x1
jax: 0.10.0
libtpu: 0.0.40
codegen_flags: <defaults>
</compile_context>

<pallas_src>
import jax
import jax.numpy as jnp
from jax.experimental import pallas as pl
from jax.experimental.pallas import tpu as pltpu


def _round_up(x, m):
    return (x + m - 1) // m * m


def _disc_kernel(xw_ref, w1_ref, b1_ref, w2_ref, b2_ref, w3_ref, b3_ref, o_ref):
    # xw_ref: (K2, TILE_N, D_in) — K2 = dsz*dsz pooling-window elements.
    k2 = xw_ref.shape[0]

    # MaxPool2d(dsz, stride=dsz): pure elementwise max across the window axis
    # (VPU work on lane-dense (TILE_N, D_in) slabs, no cross-lane shuffles).
    pooled = xw_ref[0]
    for k in range(1, k2):
        pooled = jnp.maximum(pooled, xw_ref[k])
    x = pooled.astype(jnp.float32)

    # Linear(D_in, 128) + LeakyReLU(0.2)
    h = jnp.dot(x, w1_ref[...], preferred_element_type=jnp.float32) + b1_ref[...]
    h = jnp.where(h >= 0, h, 0.2 * h)
    # Linear(128, 128) + LeakyReLU(0.2)
    h = jnp.dot(h, w2_ref[...], preferred_element_type=jnp.float32) + b2_ref[...]
    h = jnp.where(h >= 0, h, 0.2 * h)
    # Linear(128, 1) + Sigmoid
    h = jnp.dot(h, w3_ref[...], preferred_element_type=jnp.float32) + b3_ref[...]
    o_ref[...] = (1.0 / (1.0 + jnp.exp(-h))).astype(o_ref.dtype)


def discriminator_forward(img, w1, b1, w2, b2, w3, b3, *, downsample=5):
    """img: (batch, seq, H, W) -> validity (batch*seq, 1)."""
    B, S, H, W = img.shape
    dsz = downsample
    Hp, Wp = H // dsz, W // dsz
    N, D_in, K2 = B * S, Hp * Wp, dsz * dsz
    assert w1.shape[0] == D_in, "Linear-1 input dim must equal (H//dsz)*(W//dsz)"

    # ---- wrapper-side layout plumbing (metadata / XLA work, not kernel work)
    x = img[:, :, : Hp * dsz, : Wp * dsz]                 # MaxPool2d floors remainders
    x = x.reshape(B, S, Hp, dsz, Wp, dsz)
    x = x.transpose(3, 5, 0, 1, 2, 4)                     # (dy, dx, b, s, hp, wp)
    x = x.reshape(K2, N, D_in)                            # lane-dense window slab

    # Row tile: multiple of 8, capped so 2 buffers * K2 * TILE_N * D_in * 4B
    # stays well under VMEM limits (sized against v7x's 64 MiB, not v6e's 128).
    budget = 8 * 1024 * 1024
    tile_n = max(8, (budget // (2 * K2 * D_in * 4)) // 8 * 8)
    tile_n = min(512, tile_n, _round_up(N, 8))
    n_pad = _round_up(N, tile_n)
    if n_pad != N:
        x = jnp.pad(x, ((0, 0), (0, n_pad - N), (0, 0)))

    b1 = b1.reshape(1, -1)
    b2 = b2.reshape(1, -1)
    b3 = b3.reshape(1, -1)

    out = pl.pallas_call(
        _disc_kernel,
        out_shape=jax.ShapeDtypeStruct((n_pad, 1), img.dtype),
        grid=(n_pad // tile_n,),
        in_specs=[
            pl.BlockSpec((K2, tile_n, D_in), lambda i: (0, i, 0)),
            pl.BlockSpec(w1.shape, lambda i: (0, 0)),
            pl.BlockSpec(b1.shape, lambda i: (0, 0)),
            pl.BlockSpec(w2.shape, lambda i: (0, 0)),
            pl.BlockSpec(b2.shape, lambda i: (0, 0)),
            pl.BlockSpec(w3.shape, lambda i: (0, 0)),
            pl.BlockSpec(b3.shape, lambda i: (0, 0)),
        ],
        out_specs=pl.BlockSpec((tile_n, 1), lambda i: (i, 0)),
        compiler_params=pltpu.CompilerParams(
            dimension_semantics=("parallel",)),
    )(x, w1, b1, w2, b2, w3, b3)

    return out[:N]


if __name__ == "__main__":
    key = jax.random.PRNGKey(0)
    B, S, H, W = 2, 4, 20, 20
    dsz = 5
    D_in = (H // dsz) * (W // dsz)  # 16

    ks = jax.random.split(key, 7)
    img = jax.random.normal(ks[0], (B, S, H, W), dtype=jnp.float32)
    w1 = 0.1 * jax.random.normal(ks[1], (D_in, 128), dtype=jnp.float32)
    b1 = 0.1 * jax.random.normal(ks[2], (128,), dtype=jnp.float32)
    w2 = 0.1 * jax.random.normal(ks[3], (128, 128), dtype=jnp.float32)
    b2 = 0.1 * jax.random.normal(ks[4], (128,), dtype=jnp.float32)
    w3 = 0.1 * jax.random.normal(ks[5], (128, 1), dtype=jnp.float32)
    b3 = 0.1 * jax.random.normal(ks[6], (1,), dtype=jnp.float32)

    out = discriminator_forward(img, w1, b1, w2, b2, w3, b3, downsample=dsz)
    jax.block_until_ready(out)

    # Pure-JAX reference (exact PyTorch forward semantics).
    Hp, Wp = H // dsz, W // dsz
    pooled = img[:, :, : Hp * dsz, : Wp * dsz].reshape(
        B, S, Hp, dsz, Wp, dsz).max(axis=(3, 5))
    xf = pooled.reshape(B * S, Hp * Wp)
    h = xf @ w1 + b1
    h = jnp.where(h >= 0, h, 0.2 * h)
    h = h @ w2 + b2
    h = jnp.where(h >= 0, h, 0.2 * h)
    ref = jax.nn.sigmoid(h @ w3 + b3)

    assert out.shape == (B * S, 1)
    assert out.dtype == img.dtype
    assert bool(jnp.allclose(out, ref, atol=1e-5, rtol=1e-5)), float(
        jnp.max(jnp.abs(out - ref)))
    print("KERNEL_OK")
</pallas_src>

<mosaic_0001>
module attributes {stable_mosaic.version = 11 : i64} {
  func.func @_disc_kernel(%arg0: i32, %arg1: memref<25x8x16xf32, #tpu.memory_space<vmem>>, %arg2: memref<16x128xf32, #tpu.memory_space<vmem>>, %arg3: memref<1x128xf32, #tpu.memory_space<vmem>>, %arg4: memref<128x128xf32, #tpu.memory_space<vmem>>, %arg5: memref<1x128xf32, #tpu.memory_space<vmem>>, %arg6: memref<128x1xf32, #tpu.memory_space<vmem>>, %arg7: memref<1x1xf32, #tpu.memory_space<vmem>>, %arg8: memref<8x1xf32, #tpu.memory_space<vmem>>) attributes {dimension_semantics = [#tpu.dimension_semantics<parallel>], iteration_bounds = array<i64: 1>, scalar_prefetch = 0 : i64, scratch_operands = 0 : i64, tpu.core_type = #tpu.core_type<tc>, window_params = [{transform_indices = @transform_0, window_bounds = array<i64: 25, 8, 16>}, {pipeline_mode = #tpu.pipeline_mode<synchronous>, transform_indices = @transform_1, window_bounds = array<i64: 16, 128>}, {pipeline_mode = #tpu.pipeline_mode<synchronous>, transform_indices = @transform_2, window_bounds = array<i64: 1, 128>}, {pipeline_mode = #tpu.pipeline_mode<synchronous>, transform_indices = @transform_3, window_bounds = array<i64: 128, 128>}, {pipeline_mode = #tpu.pipeline_mode<synchronous>, transform_indices = @transform_4, window_bounds = array<i64: 1, 128>}, {pipeline_mode = #tpu.pipeline_mode<synchronous>, transform_indices = @transform_5, window_bounds = array<i64: 128, 1>}, {pipeline_mode = #tpu.pipeline_mode<synchronous>, transform_indices = @transform_6, window_bounds = array<i64: 1, 1>}, {transform_indices = @transform_7, window_bounds = array<i64: 8, 1>}]} {
    %c0 = arith.constant 0 : index
    %c0_0 = arith.constant 0 : index
    %c0_1 = arith.constant 0 : index
    %0 = vector.load %arg1[%c0, %c0_0, %c0_1] : memref<25x8x16xf32, #tpu.memory_space<vmem>>, vector<1x8x16xf32>
    %1 = vector.shape_cast %0 : vector<1x8x16xf32> to vector<8x16xf32>
    %c1 = arith.constant 1 : index
    %c0_2 = arith.constant 0 : index
    %c0_3 = arith.constant 0 : index
    %2 = vector.load %arg1[%c1, %c0_2, %c0_3] : memref<25x8x16xf32, #tpu.memory_space<vmem>>, vector<1x8x16xf32>
    %3 = vector.shape_cast %2 : vector<1x8x16xf32> to vector<8x16xf32>
    %4 = arith.maximumf %1, %3 : vector<8x16xf32>
    %c2 = arith.constant 2 : index
    %c0_4 = arith.constant 0 : index
    %c0_5 = arith.constant 0 : index
    %5 = vector.load %arg1[%c2, %c0_4, %c0_5] : memref<25x8x16xf32, #tpu.memory_space<vmem>>, vector<1x8x16xf32>
    %6 = vector.shape_cast %5 : vector<1x8x16xf32> to vector<8x16xf32>
    %7 = arith.maximumf %4, %6 : vector<8x16xf32>
    %c3 = arith.constant 3 : index
    %c0_6 = arith.constant 0 : index
    %c0_7 = arith.constant 0 : index
    %8 = vector.load %arg1[%c3, %c0_6, %c0_7] : memref<25x8x16xf32, #tpu.memory_space<vmem>>, vector<1x8x16xf32>
    %9 = vector.shape_cast %8 : vector<1x8x16xf32> to vector<8x16xf32>
    %10 = arith.maximumf %7, %9 : vector<8x16xf32>
    %c4 = arith.constant 4 : index
    %c0_8 = arith.constant 0 : index
    %c0_9 = arith.constant 0 : index
    %11 = vector.load %arg1[%c4, %c0_8, %c0_9] : memref<25x8x16xf32, #tpu.memory_space<vmem>>, vector<1x8x16xf32>
    %12 = vector.shape_cast %11 : vector<1x8x16xf32> to vector<8x16xf32>
    %13 = arith.maximumf %10, %12 : vector<8x16xf32>
    %c5 = arith.constant 5 : index
    %c0_10 = arith.constant 0 : index
    %c0_11 = arith.constant 0 : index
    %14 = vector.load %arg1[%c5, %c0_10, %c0_11] : memref<25x8x16xf32, #tpu.memory_space<vmem>>, vector<1x8x16xf32>
    %15 = vector.shape_cast %14 : vector<1x8x16xf32> to vector<8x16xf32>
    %16 = arith.maximumf %13, %15 : vector<8x16xf32>
    %c6 = arith.constant 6 : index
    %c0_12 = arith.constant 0 : index
    %c0_13 = arith.constant 0 : index
    %17 = vector.load %arg1[%c6, %c0_12, %c0_13] : memref<25x8x16xf32, #tpu.memory_space<vmem>>, vector<1x8x16xf32>
    %18 = vector.shape_cast %17 : vector<1x8x16xf32> to vector<8x16xf32>
    %19 = arith.maximumf %16, %18 : vector<8x16xf32>
    %c7 = arith.constant 7 : index
    %c0_14 = arith.constant 0 : index
    %c0_15 = arith.constant 0 : index
    %20 = vector.load %arg1[%c7, %c0_14, %c0_15] : memref<25x8x16xf32, #tpu.memory_space<vmem>>, vector<1x8x16xf32>
    %21 = vector.shape_cast %20 : vector<1x8x16xf32> to vector<8x16xf32>
    %22 = arith.maximumf %19, %21 : vector<8x16xf32>
    %c8 = arith.constant 8 : index
    %c0_16 = arith.constant 0 : index
    %c0_17 = arith.constant 0 : index
    %23 = vector.load %arg1[%c8, %c0_16, %c0_17] : memref<25x8x16xf32, #tpu.memory_space<vmem>>, vector<1x8x16xf32>
    %24 = vector.shape_cast %23 : vector<1x8x16xf32> to vector<8x16xf32>
    %25 = arith.maximumf %22, %24 : vector<8x16xf32>
    %c9 = arith.constant 9 : index
    %c0_18 = arith.constant 0 : index
    %c0_19 = arith.constant 0 : index
    %26 = vector.load %arg1[%c9, %c0_18, %c0_19] : memref<25x8x16xf32, #tpu.memory_space<vmem>>, vector<1x8x16xf32>
    %27 = vector.shape_cast %26 : vector<1x8x16xf32> to vector<8x16xf32>
    %28 = arith.maximumf %25, %27 : vector<8x16xf32>
    %c10 = arith.constant 10 : index
    %c0_20 = arith.constant 0 : index
    %c0_21 = arith.constant 0 : index
    %29 = vector.load %arg1[%c10, %c0_20, %c0_21] : memref<25x8x16xf32, #tpu.memory_space<vmem>>, vector<1x8x16xf32>
    %30 = vector.shape_cast %29 : vector<1x8x16xf32> to vector<8x16xf32>
    %31 = arith.maximumf %28, %30 : vector<8x16xf32>
    %c11 = arith.constant 11 : index
    %c0_22 = arith.constant 0 : index
    %c0_23 = arith.constant 0 : index
    %32 = vector.load %arg1[%c11, %c0_22, %c0_23] : memref<25x8x16xf32, #tpu.memory_space<vmem>>, vector<1x8x16xf32>
    %33 = vector.shape_cast %32 : vector<1x8x16xf32> to vector<8x16xf32>
    %34 = arith.maximumf %31, %33 : vector<8x16xf32>
    %c12 = arith.constant 12 : index
    %c0_24 = arith.constant 0 : index
    %c0_25 = arith.constant 0 : index
    %35 = vector.load %arg1[%c12, %c0_24, %c0_25] : memref<25x8x16xf32, #tpu.memory_space<vmem>>, vector<1x8x16xf32>
    %36 = vector.shape_cast %35 : vector<1x8x16xf32> to vector<8x16xf32>
    %37 = arith.maximumf %34, %36 : vector<8x16xf32>
    %c13 = arith.constant 13 : index
    %c0_26 = arith.constant 0 : index
    %c0_27 = arith.constant 0 : index
    %38 = vector.load %arg1[%c13, %c0_26, %c0_27] : memref<25x8x16xf32, #tpu.memory_space<vmem>>, vector<1x8x16xf32>
    %39 = vector.shape_cast %38 : vector<1x8x16xf32> to vector<8x16xf32>
    %40 = arith.maximumf %37, %39 : vector<8x16xf32>
    %c14 = arith.constant 14 : index
    %c0_28 = arith.constant 0 : index
    %c0_29 = arith.constant 0 : index
    %41 = vector.load %arg1[%c14, %c0_28, %c0_29] : memref<25x8x16xf32, #tpu.memory_space<vmem>>, vector<1x8x16xf32>
    %42 = vector.shape_cast %41 : vector<1x8x16xf32> to vector<8x16xf32>
    %43 = arith.maximumf %40, %42 : vector<8x16xf32>
    %c15 = arith.constant 15 : index
    %c0_30 = arith.constant 0 : index
    %c0_31 = arith.constant 0 : index
    %44 = vector.load %arg1[%c15, %c0_30, %c0_31] : memref<25x8x16xf32, #tpu.memory_space<vmem>>, vector<1x8x16xf32>
    %45 = vector.shape_cast %44 : vector<1x8x16xf32> to vector<8x16xf32>
    %46 = arith.maximumf %43, %45 : vector<8x16xf32>
    %c16 = arith.constant 16 : index
    %c0_32 = arith.constant 0 : index
    %c0_33 = arith.constant 0 : index
    %47 = vector.load %arg1[%c16, %c0_32, %c0_33] : memref<25x8x16xf32, #tpu.memory_space<vmem>>, vector<1x8x16xf32>
    %48 = vector.shape_cast %47 : vector<1x8x16xf32> to vector<8x16xf32>
    %49 = arith.maximumf %46, %48 : vector<8x16xf32>
    %c17 = arith.constant 17 : index
    %c0_34 = arith.constant 0 : index
    %c0_35 = arith.constant 0 : index
    %50 = vector.load %arg1[%c17, %c0_34, %c0_35] : memref<25x8x16xf32, #tpu.memory_space<vmem>>, vector<1x8x16xf32>
    %51 = vector.shape_cast %50 : vector<1x8x16xf32> to vector<8x16xf32>
    %52 = arith.maximumf %49, %51 : vector<8x16xf32>
    %c18 = arith.constant 18 : index
    %c0_36 = arith.constant 0 : index
    %c0_37 = arith.constant 0 : index
    %53 = vector.load %arg1[%c18, %c0_36, %c0_37] : memref<25x8x16xf32, #tpu.memory_space<vmem>>, vector<1x8x16xf32>
    %54 = vector.shape_cast %53 : vector<1x8x16xf32> to vector<8x16xf32>
    %55 = arith.maximumf %52, %54 : vector<8x16xf32>
    %c19 = arith.constant 19 : index
    %c0_38 = arith.constant 0 : index
    %c0_39 = arith.constant 0 : index
    %56 = vector.load %arg1[%c19, %c0_38, %c0_39] : memref<25x8x16xf32, #tpu.memory_space<vmem>>, vector<1x8x16xf32>
    %57 = vector.shape_cast %56 : vector<1x8x16xf32> to vector<8x16xf32>
    %58 = arith.maximumf %55, %57 : vector<8x16xf32>
    %c20 = arith.constant 20 : index
    %c0_40 = arith.constant 0 : index
    %c0_41 = arith.constant 0 : index
    %59 = vector.load %arg1[%c20, %c0_40, %c0_41] : memref<25x8x16xf32, #tpu.memory_space<vmem>>, vector<1x8x16xf32>
    %60 = vector.shape_cast %59 : vector<1x8x16xf32> to vector<8x16xf32>
    %61 = arith.maximumf %58, %60 : vector<8x16xf32>
    %c21 = arith.constant 21 : index
    %c0_42 = arith.constant 0 : index
    %c0_43 = arith.constant 0 : index
    %62 = vector.load %arg1[%c21, %c0_42, %c0_43] : memref<25x8x16xf32, #tpu.memory_space<vmem>>, vector<1x8x16xf32>
    %63 = vector.shape_cast %62 : vector<1x8x16xf32> to vector<8x16xf32>
    %64 = arith.maximumf %61, %63 : vector<8x16xf32>
    %c22 = arith.constant 22 : index
    %c0_44 = arith.constant 0 : index
    %c0_45 = arith.constant 0 : index
    %65 = vector.load %arg1[%c22, %c0_44, %c0_45] : memref<25x8x16xf32, #tpu.memory_space<vmem>>, vector<1x8x16xf32>
    %66 = vector.shape_cast %65 : vector<1x8x16xf32> to vector<8x16xf32>
    %67 = arith.maximumf %64, %66 : vector<8x16xf32>
    %c23 = arith.constant 23 : index
    %c0_46 = arith.constant 0 : index
    %c0_47 = arith.constant 0 : index
    %68 = vector.load %arg1[%c23, %c0_46, %c0_47] : memref<25x8x16xf32, #tpu.memory_space<vmem>>, vector<1x8x16xf32>
    %69 = vector.shape_cast %68 : vector<1x8x16xf32> to vector<8x16xf32>
    %70 = arith.maximumf %67, %69 : vector<8x16xf32>
    %c24 = arith.constant 24 : index
    %c0_48 = arith.constant 0 : index
    %c0_49 = arith.constant 0 : index
    %71 = vector.load %arg1[%c24, %c0_48, %c0_49] : memref<25x8x16xf32, #tpu.memory_space<vmem>>, vector<1x8x16xf32>
    %72 = vector.shape_cast %71 : vector<1x8x16xf32> to vector<8x16xf32>
    %73 = arith.maximumf %70, %72 : vector<8x16xf32>
    %c0_50 = arith.constant 0 : index
    %c0_51 = arith.constant 0 : index
    %74 = vector.load %arg2[%c0_50, %c0_51] : memref<16x128xf32, #tpu.memory_space<vmem>>, vector<16x128xf32>
    %cst = arith.constant dense<0.000000e+00> : vector<8x128xf32>
    %75 = tpu.matmul %73, %74, %cst {dimension_numbers = #tpu.dot_dimension_numbers<[1], [0], [0], [1], [0, 0, 1, 1], [], []>} : vector<8x16xf32>, vector<16x128xf32>, vector<8x128xf32> -> vector<8x128xf32>
    %c0_52 = arith.constant 0 : index
    %c0_53 = arith.constant 0 : index
    %76 = vector.load %arg3[%c0_52, %c0_53] : memref<1x128xf32, #tpu.memory_space<vmem>>, vector<1x128xf32>
    %77 = vector.broadcast %76 : vector<1x128xf32> to vector<8x128xf32>
    %78 = arith.addf %75, %77 : vector<8x128xf32>
    %cst_54 = arith.constant 0.000000e+00 : f32
    %79 = vector.broadcast %cst_54 : f32 to vector<8x128xf32>
    %80 = arith.cmpf oge, %78, %79 : vector<8x128xf32>
    %cst_55 = arith.constant 2.000000e-01 : f32
    %81 = vector.broadcast %cst_55 : f32 to vector<8x128xf32>
    %82 = arith.mulf %81, %78 : vector<8x128xf32>
    %83 = arith.select %80, %78, %82 : vector<8x128xi1>, vector<8x128xf32>
    %c0_56 = arith.constant 0 : index
    %c0_57 = arith.constant 0 : index
    %84 = vector.load %arg4[%c0_56, %c0_57] : memref<128x128xf32, #tpu.memory_space<vmem>>, vector<128x128xf32>
    %cst_58 = arith.constant dense<0.000000e+00> : vector<8x128xf32>
    %85 = tpu.matmul %83, %84, %cst_58 {dimension_numbers = #tpu.dot_dimension_numbers<[1], [0], [0], [1], [0, 0, 1, 1], [], []>} : vector<8x128xf32>, vector<128x128xf32>, vector<8x128xf32> -> vector<8x128xf32>
    %c0_59 = arith.constant 0 : index
    %c0_60 = arith.constant 0 : index
    %86 = vector.load %arg5[%c0_59, %c0_60] : memref<1x128xf32, #tpu.memory_space<vmem>>, vector<1x128xf32>
    %87 = vector.broadcast %86 : vector<1x128xf32> to vector<8x128xf32>
    %88 = arith.addf %85, %87 : vector<8x128xf32>
    %cst_61 = arith.constant 0.000000e+00 : f32
    %89 = vector.broadcast %cst_61 : f32 to vector<8x128xf32>
    %90 = arith.cmpf oge, %88, %89 : vector<8x128xf32>
    %cst_62 = arith.constant 2.000000e-01 : f32
    %91 = vector.broadcast %cst_62 : f32 to vector<8x128xf32>
    %92 = arith.mulf %91, %88 : vector<8x128xf32>
    %93 = arith.select %90, %88, %92 : vector<8x128xi1>, vector<8x128xf32>
    %c0_63 = arith.constant 0 : index
    %c0_64 = arith.constant 0 : index
    %94 = vector.load %arg6[%c0_63, %c0_64] : memref<128x1xf32, #tpu.memory_space<vmem>>, vector<128x1xf32>
    %cst_65 = arith.constant dense<0.000000e+00> : vector<8x1xf32>
    %95 = tpu.matmul %93, %94, %cst_65 {dimension_numbers = #tpu.dot_dimension_numbers<[1], [0], [0], [1], [0, 0, 1, 1], [], []>} : vector<8x128xf32>, vector<128x1xf32>, vector<8x1xf32> -> vector<8x1xf32>
    %c0_66 = arith.constant 0 : index
    %c0_67 = arith.constant 0 : index
    %96 = vector.load %arg7[%c0_66, %c0_67] : memref<1x1xf32, #tpu.memory_space<vmem>>, vector<1x1xf32>
    %97 = vector.broadcast %96 : vector<1x1xf32> to vector<8x1xf32>
    %98 = arith.addf %95, %97 : vector<8x1xf32>
    %cst_68 = arith.constant 0.000000e+00 : f32
    %99 = vector.broadcast %cst_68 : f32 to vector<8x1xf32>
    %100 = arith.subf %99, %98 : vector<8x1xf32>
    %101 = math.exp %100 : vector<8x1xf32>
    %cst_69 = arith.constant 1.000000e+00 : f32
    %102 = vector.broadcast %cst_69 : f32 to vector<8x1xf32>
    %103 = arith.addf %102, %101 : vector<8x1xf32>
    %cst_70 = arith.constant 1.000000e+00 : f32
    %104 = vector.broadcast %cst_70 : f32 to vector<8x1xf32>
    %105 = arith.divf %104, %103 : vector<8x1xf32>
    %c0_71 = arith.constant 0 : index
    %c0_72 = arith.constant 0 : index
    %106 = vector.load %arg8[%c0_71, %c0_72] : memref<8x1xf32, #tpu.memory_space<vmem>>, vector<8x1xf32>
    tpu.vector_store %arg8[%c0_71, %c0_72], %105 {strides = array<i32>} : memref<8x1xf32, #tpu.memory_space<vmem>>, vector<8x1xf32>,
    return
  }
  func.func @transform_0(%arg0: i32) -> (i32, i32, i32) {
    %c0_i32 = arith.constant 0 : i32
    %c0_i32_0 = arith.constant 0 : i32
    %c0_i32_1 = arith.constant 0 : i32
    return %c0_i32, %arg0, %c0_i32_0 : i32, i32, i32
  }
  func.func @transform_1(%arg0: i32) -> (i32, i32) {
    %c0_i32 = arith.constant 0 : i32
    %c0_i32_0 = arith.constant 0 : i32
    %c0_i32_1 = arith.constant 0 : i32
    return %c0_i32, %c0_i32_0 : i32, i32
  }
  func.func @transform_2(%arg0: i32) -> (i32, i32) {
    %c0_i32 = arith.constant 0 : i32
    %c0_i32_0 = arith.constant 0 : i32
    %c0_i32_1 = arith.constant 0 : i32
    return %c0_i32, %c0_i32_0 : i32, i32
  }
  func.func @transform_3(%arg0: i32) -> (i32, i32) {
    %c0_i32 = arith.constant 0 : i32
    %c0_i32_0 = arith.constant 0 : i32
    %c0_i32_1 = arith.constant 0 : i32
    return %c0_i32, %c0_i32_0 : i32, i32
  }
  func.func @transform_4(%arg0: i32) -> (i32, i32) {
    %c0_i32 = arith.constant 0 : i32
    %c0_i32_0 = arith.constant 0 : i32
    %c0_i32_1 = arith.constant 0 : i32
    return %c0_i32, %c0_i32_0 : i32, i32
  }
  func.func @transform_5(%arg0: i32) -> (i32, i32) {
    %c0_i32 = arith.constant 0 : i32
    %c0_i32_0 = arith.constant 0 : i32
    %c0_i32_1 = arith.constant 0 : i32
    return %c0_i32, %c0_i32_0 : i32, i32
  }
  func.func @transform_6(%arg0: i32) -> (i32, i32) {
    %c0_i32 = arith.constant 0 : i32
    %c0_i32_0 = arith.constant 0 : i32
    %c0_i32_1 = arith.constant 0 : i32
    return %c0_i32, %c0_i32_0 : i32, i32
  }
  func.func @transform_7(%arg0: i32) -> (i32, i32) {
    %c0_i32 = arith.constant 0 : i32
    %c0_i32_0 = arith.constant 0 : i32
    return %arg0, %c0_i32 : i32, i32
  }
}

</mosaic_0001>

<bundles_post_ra>
// kernel: tpu_custom_call.1
= control target key start
LH: loop header
LB: loop body
LE: loop exit
PB: predicated region body
PF: predicated region fallthrough
CT: control target
= control target key end

     0   :  { %v588_v0 = vmov 0.0|0.0   ;;  %vm589_vm0 = vmmov 0   ;;  %v590_v3 = vmov 0.0   ;;  %vm110_vm1 = vcmask 130048   ;;  %s843_s1 = inlined_call_operand.vmem [shape: f32[16,128], index: 1, kind: input, shape index: {}]   ;;  %s844_s0 = inlined_call_operand.vmem [shape: f32[25,8,16], index: 0, kind: input, shape index: {}]   ;;  %s845_s3 = inlined_call_operand.vmem [shape: f32[128,128], index: 3, kind: input, shape index: {}]   ;;  %s846_s5 = inlined_call_operand.vmem [shape: f32[128,1], index: 5, kind: input, shape index: {}]   ;;  %s847_s2 = inlined_call_operand.vmem [shape: f32[1,128], index: 2, kind: input, shape index: {}]   ;;  %s848_s6 = inlined_call_operand.<no memory space> [shape: f32[1,1], index: 6, kind: input, shape index: {}]   ;;  %s849_s4 = inlined_call_operand.vmem [shape: f32[1,128], index: 4, kind: input, shape index: {}]   ;;  %s850_s7 = inlined_call_operand.vmem [shape: f32[8,1], index: 7, kind: output, shape index: {}]  }
   0x1   :  { %530 = vmatprep.subr.bf16.mxu0 %v588_v0  ;;  %v101_v1 = vld [vmem:[%s843_s1] sm:$0xff]  ;;  %v102_v2 = vld [vmem:[%s843_s1 + $0x8] sm:$0xff]  ;;  %457 = vmatprep.mubr.msk.f32.mxu0 %vm589_vm0, %v590_v3  ;;  %v389_v7 = vld [vmem:[%s844_s0 + $0x10] sm:$0xff]  ;;  %vm382_vm4 = vcmask 7168  }
   0x2   :  { %v28_v4 = vld [vmem:[%s844_s0] sm:$0xff]  ;;  %v531_v5 = vpack.c.bf16 %v102_v2, %v101_v1  ;;  %v388_v6 = vld [vmem:[%s844_s0 + $0x8] sm:$0xff]  ;;  %533 = vmatprep.subr.bf16.mxu1 %v588_v0  ;;  %492 = vmatprep.mubr.msk.f32.mxu1 %vm589_vm0, %v590_v3  ;;  %v390_v9 = vld [vmem:[%s844_s0 + $0x18] sm:$0xff] }
   0x3   :  { %v31_v8 = vmax.f32 %v28_v4, %v388_v6  ;;  %v391_v11 = vld [vmem:[%s844_s0 + $0x20] sm:$0xff]  ;;  %v392_v13 = vld [vmem:[%s844_s0 + $0x28] sm:$0xff]  ;;  %v393_v15 = vld [vmem:[%s844_s0 + $0x30] sm:$0xff] }
   0x4   :  { %532 = vmatpush3.bf16.msra.mxu0 %v531_v5  ;;  %v187_v16 = vld [vmem:[%s845_s3] sm:$0xff]  ;;  %v188_v17 = vld [vmem:[%s845_s3 + $0x8] sm:$0xff]  ;;  %v189_v18 = vld [vmem:[%s845_s3 + $0x10] sm:$0xff] }
   0x5   :  { %v34_v10 = vmax.f32 %v31_v8, %v389_v7  ;;  %557 = vmatprep.subr.bf16.mxu0 %v588_v0  ;;  %v534_v20 = vpack.c.bf16 %v188_v17, %v187_v16  ;;  %v190_v21 = vld [vmem:[%s845_s3 + $0x18] sm:$0xff]  ;;  %v395_v25 = vld [vmem:[%s844_s0 + $0x40] sm:$0xff]  ;;  %v192_v27 = vld [vmem:[%s845_s3 + $0x28] sm:$0xff] }
   0x6   :  { %v394_v22 = vld [vmem:[%s844_s0 + $0x38] sm:$0xff]  ;;  %v537_v24 = vpack.c.bf16 %v190_v21, %v189_v18  ;;  %v191_v26 = vld [vmem:[%s845_s3 + $0x20] sm:$0xff]  ;;  %v396_v29 = vld [vmem:[%s844_s0 + $0x48] sm:$0xff] }
   0x7   :  { %v37_v12 = vmax.f32 %v34_v10, %v390_v9  ;;  %535 = vmatpush3.bf16.msra.mxu1 %v534_v20  ;;  %v540_v31 = vpack.c.bf16 %v192_v27, %v191_v26  ;;  %v397_v32 = vld [vmem:[%s844_s0 + $0x50] sm:$0xff]  ;;  %v194_v34 = vld [vmem:[%s845_s3 + $0x38] sm:$0xff]  ;;  %v399_v39 = vld [vmem:[%s844_s0 + $0x60] sm:$0xff] }
   0x8   :  { %536 = vmatprep.subr.bf16.mxu1 %v588_v0  ;;  %v193_v33 = vld [vmem:[%s845_s3 + $0x30] sm:$0xff]  ;;  %v398_v36 = vld [vmem:[%s844_s0 + $0x58] sm:$0xff]  ;;  %v195_v40 = vld [vmem:[%s845_s3 + $0x40] sm:$0xff] }
   0x9   :  { %v40_v14 = vmax.f32 %v37_v12, %v391_v11  ;;  %v543_v38 = vpack.c.bf16 %v194_v34, %v193_v33  ;;  %v196_v41 = vld [vmem:[%s845_s3 + $0x48] sm:$0xff]  ;;  %v401_v46 = vld [vmem:[%s844_s0 + $0x70] sm:$0xff]  ;;  %v198_v48 = vld [vmem:[%s845_s3 + $0x58] sm:$0xff] }
   0xa   :  { %v400_v43 = vld [vmem:[%s844_s0 + $0x68] sm:$0xff]  ;;  %v546_v45 = vpack.c.bf16 %v196_v41, %v195_v40  ;;  %v197_v47 = vld [vmem:[%s845_s3 + $0x50] sm:$0xff]  ;;  %v402_v50 = vld [vmem:[%s844_s0 + $0x78] sm:$0xff] }
   0xb   :  { %v43_v19 = vmax.f32 %v40_v14, %v392_v13  ;;  %538 = vmatpush3.bf16.msra.mxu1 %v537_v24  ;;  %v549_v52 = vpack.c.bf16 %v198_v48, %v197_v47  ;;  %v403_v53 = vld [vmem:[%s844_s0 + $0x80] sm:$0xff]  ;;  %v200_v55 = vld [vmem:[%s845_s3 + $0x68] sm:$0xff]  ;;  %v405_v60 = vld [vmem:[%s844_s0 + $0x90] sm:$0xff] }
   0xc   :  { %539 = vmatprep.subr.bf16.mxu1 %v588_v0  ;;  %v199_v54 = vld [vmem:[%s845_s3 + $0x60] sm:$0xff]  ;;  %v404_v57 = vld [vmem:[%s844_s0 + $0x88] sm:$0xff]  ;;  %v406_v62 = vld [vmem:[%s844_s0 + $0x98] sm:$0xff] }
   0xd   :  { %v46_v23 = vmax.f32 %v43_v19, %v393_v15  ;;  %v552_v59 = vpack.c.bf16 %v200_v55, %v199_v54  ;;  %v407_v1 = vld [vmem:[%s844_s0 + $0xa0] sm:$0xff]  ;;  %v408_v4 = vld [vmem:[%s844_s0 + $0xa8] sm:$0xff]  ;;  %v409_v6 = vld [vmem:[%s844_s0 + $0xb0] sm:$0xff] }
   0xe   :  { %v410_v8 = vld [vmem:[%s844_s0 + $0xb8] sm:$0xff]  ;;  %v411_v10 = vld [vmem:[%s844_s0 + $0xc0] sm:$0xff]  ;;  %v201_v13 = vld [vmem:[%s845_s3 + $0x70] sm:$0xff] }
   0xf   :  { %v49_v28 = vmax.f32 %v46_v23, %v394_v22  ;;  %541 = vmatpush3.bf16.msra.mxu1 %v540_v31  ;;  %v202_v14 = vld [vmem:[%s845_s3 + $0x78] sm:$0xff]  ;;  %v283_v16 = vld [vmem:[%s846_s5] sm:$0xff]  ;;  %v284_v17 = vld [vmem:[%s846_s5 + $0x8] sm:$0xff] }
  0x10   :  { %542 = vmatprep.subr.bf16.mxu1 %v588_v0  ;;  %v555_v15 = vpack.c.bf16 %v202_v14, %v201_v13  ;;  %v558_v18 = vpack.c.bf16 %v284_v17, %v283_v16  ;;  %v286_v19 = vld [vmem:[%s846_s5 + $0x18] sm:$0xff]  ;;  %v287_v21 = vld [vmem:[%s846_s5 + $0x20] sm:$0xff]  ;;  %v288_v22 = vld [vmem:[%s846_s5 + $0x28] sm:$0xff] }
  0x11   :  { %v52_v30 = vmax.f32 %v49_v28, %v395_v25  ;;  %v564_v23 = vpack.c.bf16 %v288_v22, %v287_v21  ;;  %v289_v24 = vld [vmem:[%s846_s5 + $0x30] sm:$0xff]  ;;  %v290_v25 = vld [vmem:[%s846_s5 + $0x38] sm:$0xff]  ;;  %v291_v27 = vld [vmem:[%s846_s5 + $0x40] sm:$0xff] }
  0x12   :  { %v567_v26 = vpack.c.bf16 %v290_v25, %v289_v24  ;;  %v292_v28 = vld [vmem:[%s846_s5 + $0x48] sm:$0xff]  ;;  %v294_v31 = vld [vmem:[%s846_s5 + $0x58] sm:$0xff]  ;;  %v295_v33 = vld [vmem:[%s846_s5 + $0x60] sm:$0xff] }
  0x13   :  { %v55_v35 = vmax.f32 %v52_v30, %v396_v29  ;;  %544 = vmatpush3.bf16.msra.mxu1 %v543_v38  ;;  %v570_v29 = vpack.c.bf16 %v292_v28, %v291_v27  ;;  %v293_v30 = vld [vmem:[%s846_s5 + $0x50] sm:$0xff]  ;;  %v296_v34 = vld [vmem:[%s846_s5 + $0x68] sm:$0xff] }
  0x14   :  { %545 = vmatprep.subr.bf16.mxu1 %v588_v0 }
  0x15   :  { %v58_v37 = vmax.f32 %v55_v35, %v397_v32  ;;  %v573_v32 = vpack.c.bf16 %v294_v31, %v293_v30  ;;  %v576_v35 = vpack.c.bf16 %v296_v34, %v295_v33 }
  0x17   :  { %v61_v42 = vmax.f32 %v58_v37, %v398_v36  ;;  %547 = vmatpush3.bf16.msra.mxu1 %v546_v45  ;;  %v412_v36 = vld [vmem:[%s847_s2] ss:$0 sm:$0xff] }
  0x18   :  { %548 = vmatprep.subr.bf16.mxu1 %v588_v0  ;;  %v414_v45 = vld [vmem:[%s849_s4] ss:$0 sm:$0xff] }
  0x19   :  { %v64_v44 = vmax.f32 %v61_v42, %v399_v39  ;;  %v297_v42 = vld [vmem:[%s846_s5 + $0x70] sm:$0xff] }
  0x1b   :  { %v67_v49 = vmax.f32 %v64_v44, %v400_v43  ;;  %550 = vmatpush3.bf16.msra.mxu1 %v549_v52  ;;  %v298_v43 = vld [vmem:[%s846_s5 + $0x78] sm:$0xff]  ;;  %v12_v44 = vstv %s848_s6 }
  0x1c   :  { %551 = vmatprep.subr.bf16.mxu1 %v588_v0  ;;  %13 = vst [vmem:[#allocation2] sm:$0x1] %v12_v44 }
  0x1d   :  { %v70_v51 = vmax.f32 %v67_v49, %v401_v46 }
  0x1f   :  { %v73_v56 = vmax.f32 %v70_v51, %v402_v50  ;;  %553 = vmatpush3.bf16.msra.mxu1 %v552_v59 }
  0x20   :  { %554 = vmatprep.subr.bf16.mxu1 %v588_v0 }
  0x21   :  { %v76_v58 = vmax.f32 %v73_v56, %v403_v53 }
  0x23   :  { %v79_v61 = vmax.f32 %v76_v58, %v404_v57  ;;  %556 = vmatpush3.bf16.msra.mxu1 %v555_v15  ;;  %v415_v51 = vld [vmem:[#allocation2] ss:$0 sm:$0xff] }
  0x25   :  { %v82_v63 = vmax.f32 %v79_v61, %v405_v60 }
  0x27   :  { %v85_v2 = vmax.f32 %v82_v63, %v406_v62 }
  0x29   :  { %v88_v5 = vmax.f32 %v85_v2, %v407_v1 }
  0x2b   :  { %v91_v7 = vmax.f32 %v88_v5, %v408_v4 }
  0x2d   :  { %v94_v9 = vmax.f32 %v91_v7, %v409_v6 }
  0x2f   :  { %v97_v11 = vmax.f32 %v94_v9, %v410_v8 }
  0x31   :  { %v100_v12 = vmax.f32 %v97_v11, %v411_v10 }
  0x33   :  { %458 = vmatmul.mubr.msk.f32.vlgmr.msra.gmra.mrb[0].mxu0 %vm110_vm1, %v100_v12 }
  0x34   :  { %527 = vmatprep.mubr.msk.f32.mxu0 %vm589_vm0, %v590_v3  ;;  %v285_v3 = vld [vmem:[%s846_s5 + $0x10] sm:$0xff]  ;;  %559 = vmatpush3.bf16.msra.mxu0 %v558_v18 }
  0x35   :  { %v561_v20 = vpack.c.bf16 %v286_v19, %v285_v3  ;;  %560 = vmatprep.subr.bf16.mxu0 %v588_v0 }
  0x38   :  { %562 = vmatpush3.bf16.msra.mxu0 %v561_v20 }
  0x39   :  { %563 = vmatprep.subr.bf16.mxu0 %v588_v0 }
  0x3c   :  { %565 = vmatpush3.bf16.msra.mxu0 %v564_v23 }
  0x3d   :  { %566 = vmatprep.subr.bf16.mxu0 %v588_v0 }
  0x40   :  { %568 = vmatpush3.bf16.msra.mxu0 %v567_v26 }
  0x41   :  { %569 = vmatprep.subr.bf16.mxu0 %v588_v0 }
  0x44   :  { %571 = vmatpush3.bf16.msra.mxu0 %v570_v29 }
  0x45   :  { %572 = vmatprep.subr.bf16.mxu0 %v588_v0 }
  0x48   :  { %574 = vmatpush3.bf16.msra.mxu0 %v573_v32 }
  0x49   :  { %575 = vmatprep.subr.bf16.mxu0 %v588_v0 }
  0x4c   :  { %577 = vmatpush3.bf16.msra.mxu0 %v576_v35 }
  0x4d   :  { %578 = vmatprep.subr.bf16.mxu0 %v588_v0  ;;  %v579_v0 = vpack.c.bf16 %v298_v43, %v297_v42 }
  0x50   :  { %580 = vmatpush3.bf16.msra.mxu0 %v579_v0 }
 0x106   :  { %v180_v37 = vpop.f32.mrb[0].mxu0 }
 0x107   :  { %v181_v38 = vadd.f32 %v412_v36, %v180_v37  ;;  %v459_v39 = vpop.f32.mrb[1].mxu0 }
 0x109   :  { %v185_v40 = vmul.f32 0.2, %v181_v38  ;;  %vm184_vm2 = vcmp.ge.f32.partialorder %v181_v38, 0.0 }
 0x10b   :  { %v186_v41 = vsel %vm184_vm2, %v181_v38, %v185_v40 }
 0x10c   :  { %493 = vmatmul.mubr.f32.vlgmr.msra.gmra.mrb[0].mxu1 %v186_v41 }
 0x1df   :  { %v276_v46 = vpop.f32.mrb[0].mxu1 }
 0x1e0   :  { %v277_v47 = vadd.f32 %v414_v45, %v276_v46  ;;  %v494_v48 = vpop.f32.mrb[1].mxu1 }
 0x1e2   :  { %vm280_vm3 = vcmp.ge.f32.partialorder %v277_v47, 0.0  ;;  %v281_v49 = vmul.f32 0.2, %v277_v47 }
 0x1e4   :  { %v282_v50 = vsel %vm280_vm3, %v277_v47, %v281_v49 }
 0x1e5   :  { %528 = vmatmul.mubr.f32.vlgmr.msra.gmra.mrb[2].mxu0 %v282_v50 }
 0x2b8   :  { %v372_v52 = vpop.f32.mrb[2].mxu0 }
 0x2b9   :  { %v373_v53 = vadd.f32 %v415_v51, %v372_v52  ;;  %v529_v54 = vpop.f32.mrb[3].mxu0 }
 0x2bb   :  { %v376_v55 = vsub.f32 0.0, %v373_v53 }
 0x2bd   :  { %v377_v56 = vmul.f32 1.442695, %v376_v55 }
 0x2bf   :  { %584 = vpow2.f32 %v377_v56 }
 0x2c9   :  { %v585_v57 = vpop.eup %584 }
 0x2ca   :  { %v379_v58 = vadd.f32 1.0, %v585_v57 }
 0x2cc   :  { %586 = vrcp.f32 %v379_v58 }
 0x2d6   :  { %v587_v59 = vpop.eup %586 }
 0x2d7   :  { %383 = vst.msk [vmem:[%s850_s7] sm:$0xff] %vm382_vm4, %v587_v59 }

</bundles_post_ra>
